<compile_context>
chip_gen: v7x
topology: tpu7x:2x2x1
jax: 0.10.0
libtpu: 0.0.40
codegen_flags: <defaults>
</compile_context>

<pallas_src>
import jax
import jax.numpy as jnp
import numpy as np
from jax import lax
from jax.experimental import pallas as pl
from jax.experimental.pallas import tpu as pltpu


# --------------------------------------------------------------------------
# VMEM budgeting (generation-aware, conservative fallback)
# --------------------------------------------------------------------------
def _vmem_budget():
    cap = 64 * 1024 * 1024                          # v7x per-TC capacity: safe lower bound
    try:
        info = pltpu.get_tpu_info()
        cap = int(getattr(info, "vmem_capacity_bytes", cap))
    except Exception:
        pass
    vmem_limit = min(cap // 2, 64 * 1024 * 1024)    # leave headroom below physical
    stream_tile_bytes = vmem_limit // 4             # per-buffer budget for streamed tiles
    return vmem_limit, stream_tile_bytes


def _pick_batch_tile(B, row_bytes, stream_tile_bytes):
    """Largest batch tile: full B when B <= 8 (one grid step, full-dim block),
    otherwise a multiple of 8 whose streamed rows fit the per-buffer budget."""
    if B <= 8:
        return B
    tb = stream_tile_bytes // max(row_bytes, 1)
    tb = max(8, (tb // 8) * 8)
    return min(tb, (B // 8) * 8)


# --------------------------------------------------------------------------
# Kernels
# --------------------------------------------------------------------------
def _hyper_batched_kernel(z_ref, wpo_ref, bpo_ref, wpr_ref, bpr_ref,
                          x_ref, px_ref, o_ref):
    """3-D branch (einsum 'bd,bad->ba') over a (TB, A, F) tile.
    Weights arrive pre-scaled and pre-transposed as (D, F); theta is computed once
    per batch tile on the MXU; the contraction over F is a VPU multiply + lane reduce."""
    z = z_ref[...]                                                           # (TB, D)
    th_p = jnp.dot(z, wpo_ref[...], preferred_element_type=jnp.float32) + bpo_ref[...]
    th_q = jnp.dot(z, wpr_ref[...], preferred_element_type=jnp.float32) + bpr_ref[...]
    out = jnp.sum(th_p[:, None, :] * x_ref[...], axis=-1)                    # (TB, A)
    out = out + jnp.sum(th_q[:, None, :] * px_ref[...], axis=-1)
    o_ref[...] = out.astype(o_ref.dtype)


def _hyper_elem_kernel(z_ref, wpo_ref, bpo_ref, wpr_ref, bpr_ref,
                       x_ref, px_ref, o_ref):
    """Matched-2D branch: out[b] = sum_f theta[b,f]*x[b,f] + prior part, over (TB, F) tiles."""
    z = z_ref[...]                                                           # (TB, D)
    th_p = jnp.dot(z, wpo_ref[...], preferred_element_type=jnp.float32) + bpo_ref[...]
    th_q = jnp.dot(z, wpr_ref[...], preferred_element_type=jnp.float32) + bpr_ref[...]
    out = jnp.sum(th_p * x_ref[...] + th_q * px_ref[...], axis=-1, keepdims=True)
    o_ref[...] = out.astype(o_ref.dtype)


def _hyper_mm_kernel(z_ref, wpo_ref, bpo_ref, wpr_ref, bpr_ref,
                     x_ref, px_ref, o_ref, thp_ref, thq_ref):
    """Mismatched-2D branch: out = theta @ x.T over a (TM, TN) output tile.
    theta is computed once per batch tile (j == 0) into VMEM scratch and reused
    across all N tiles; dot_general contracts F-against-F (no in-kernel transpose)."""
    j = pl.program_id(1)

    @pl.when(j == 0)
    def _():
        z = z_ref[...]
        thp_ref[...] = jnp.dot(z, wpo_ref[...],
                               preferred_element_type=jnp.float32) + bpo_ref[...]
        thq_ref[...] = jnp.dot(z, wpr_ref[...],
                               preferred_element_type=jnp.float32) + bpr_ref[...]

    dn = (((1,), (1,)), ((), ()))                     # contract F with F, no batch dims
    out = lax.dot_general(thp_ref[...], x_ref[...], dn,
                          preferred_element_type=jnp.float32)
    out = out + lax.dot_general(thq_ref[...], px_ref[...], dn,
                                preferred_element_type=jnp.float32)
    o_ref[...] = out.astype(o_ref.dtype)


# --------------------------------------------------------------------------
# Wrapper (mirrors HyperLinear.forward branching)
# --------------------------------------------------------------------------
def _prep_params(params, prior_scale, posterior_scale):
    wh, bh = params["w_hyper"], params["b_hyper"]
    wp, bp = params["w_prior"], params["b_prior"]
    F = wh.shape[0]
    # Scales baked in, weights pre-transposed to (D, F) so kernels never transpose.
    w_post_t = (posterior_scale * wh).T.astype(jnp.float32)     # (D, F)
    w_prior_t = (prior_scale * wp).T.astype(jnp.float32)        # (D, F)
    b_post = (posterior_scale * bh).reshape(1, F).astype(jnp.float32)
    b_prior = (prior_scale * bp).reshape(1, F).astype(jnp.float32)
    return w_post_t, w_prior_t, b_post, b_prior


def hyperlinear_forward(z, x, prior_x, params, *, prior_scale=1.0, posterior_scale=1.0):
    z = jnp.asarray(z, jnp.float32)
    x = jnp.asarray(x, jnp.float32)
    prior_x = jnp.asarray(prior_x, jnp.float32)
    w_post_t, w_prior_t, b_post, b_prior = _prep_params(params, prior_scale, posterior_scale)

    B, D = z.shape
    F = w_post_t.shape[1]
    vmem_limit, stream_bytes = _vmem_budget()

    if x.ndim > 2:
        # out = posterior*einsum('bd,bad->ba', theta, x) + prior*einsum(..., prior_x)
        A = x.shape[1]
        row_bytes = (2 * A * F + D + A) * 4
        TB = _pick_batch_tile(B, row_bytes, stream_bytes)
        return pl.pallas_call(
            _hyper_batched_kernel,
            out_shape=jax.ShapeDtypeStruct((B, A), jnp.float32),
            grid_spec=pltpu.PrefetchScalarGridSpec(
                num_scalar_prefetch=0,
                grid=(pl.cdiv(B, TB),),
                in_specs=[
                    pl.BlockSpec((TB, D), lambda i: (i, 0)),         # z
                    pl.BlockSpec((D, F), lambda i: (0, 0)),          # W_post^T (resident)
                    pl.BlockSpec((1, F), lambda i: (0, 0)),          # b_post
                    pl.BlockSpec((D, F), lambda i: (0, 0)),          # W_prior^T (resident)
                    pl.BlockSpec((1, F), lambda i: (0, 0)),          # b_prior
                    pl.BlockSpec((TB, A, F), lambda i: (i, 0, 0)),   # x
                    pl.BlockSpec((TB, A, F), lambda i: (i, 0, 0)),   # prior_x
                ],
                out_specs=pl.BlockSpec((TB, A), lambda i: (i, 0)),
            ),
            compiler_params=pltpu.CompilerParams(
                dimension_semantics=("parallel",),
                vmem_limit_bytes=vmem_limit),
        )(z, w_post_t, b_post, w_prior_t, b_prior, x, prior_x)

    elif x.shape[0] != z.shape[0]:
        # out = posterior*(theta @ x.T) + prior*(prior_theta @ prior_x.T)  -> (B, N)
        N = x.shape[0]
        TM = B if B <= 8 else min((B // 8) * 8, 256)
        if N <= 128:
            TN = N
        else:
            max_tn = max(128, (stream_bytes // (F * 4)) // 128 * 128)
            TN = min((N // 128) * 128, max_tn, 2048)
        return pl.pallas_call(
            _hyper_mm_kernel,
            out_shape=jax.ShapeDtypeStruct((B, N), jnp.float32),
            grid_spec=pltpu.PrefetchScalarGridSpec(
                num_scalar_prefetch=0,
                grid=(pl.cdiv(B, TM), pl.cdiv(N, TN)),
                in_specs=[
                    pl.BlockSpec((TM, D), lambda i, j: (i, 0)),      # z
                    pl.BlockSpec((D, F), lambda i, j: (0, 0)),       # W_post^T
                    pl.BlockSpec((1, F), lambda i, j: (0, 0)),       # b_post
                    pl.BlockSpec((D, F), lambda i, j: (0, 0)),       # W_prior^T
                    pl.BlockSpec((1, F), lambda i, j: (0, 0)),       # b_prior
                    pl.BlockSpec((TN, F), lambda i, j: (j, 0)),      # x
                    pl.BlockSpec((TN, F), lambda i, j: (j, 0)),      # prior_x
                ],
                out_specs=pl.BlockSpec((TM, TN), lambda i, j: (i, j)),
                scratch_shapes=[pltpu.VMEM((TM, F), jnp.float32),    # theta (posterior, scaled)
                                pltpu.VMEM((TM, F), jnp.float32)],   # theta (prior, scaled)
            ),
            compiler_params=pltpu.CompilerParams(
                dimension_semantics=("parallel", "arbitrary"),
                vmem_limit_bytes=vmem_limit),
        )(z, w_post_t, b_post, w_prior_t, b_prior, x, prior_x)

    else:
        # out = posterior*(x * theta).sum(-1) + prior*(prior_x * prior_theta).sum(-1) -> (B,)
        row_bytes = (2 * F + D + 1) * 4
        TB = _pick_batch_tile(B, row_bytes, stream_bytes)
        out = pl.pallas_call(
            _hyper_elem_kernel,
            out_shape=jax.ShapeDtypeStruct((B, 1), jnp.float32),
            grid_spec=pltpu.PrefetchScalarGridSpec(
                num_scalar_prefetch=0,
                grid=(pl.cdiv(B, TB),),
                in_specs=[
                    pl.BlockSpec((TB, D), lambda i: (i, 0)),         # z
                    pl.BlockSpec((D, F), lambda i: (0, 0)),          # W_post^T
                    pl.BlockSpec((1, F), lambda i: (0, 0)),          # b_post
                    pl.BlockSpec((D, F), lambda i: (0, 0)),          # W_prior^T
                    pl.BlockSpec((1, F), lambda i: (0, 0)),          # b_prior
                    pl.BlockSpec((TB, F), lambda i: (i, 0)),         # x
                    pl.BlockSpec((TB, F), lambda i: (i, 0)),         # prior_x
                ],
                out_specs=pl.BlockSpec((TB, 1), lambda i: (i, 0)),
            ),
            compiler_params=pltpu.CompilerParams(
                dimension_semantics=("parallel",),
                vmem_limit_bytes=vmem_limit),
        )(z, w_post_t, b_post, w_prior_t, b_prior, x, prior_x)
        return out[:, 0]


# --------------------------------------------------------------------------
# Deterministic parameter init (mirrors module __init__ semantics)
# --------------------------------------------------------------------------
def init_params(key, noise_dim, out_features, prior_mean=0.0, prior_std=1.0):
    k_w, k_b, k_p = jax.random.split(key, 3)
    # hypermodel = nn.Linear(noise_dim, out_features): U(-1/sqrt(D), 1/sqrt(D))
    bound = 1.0 / np.sqrt(noise_dim)
    w_hyper = jax.random.uniform(k_w, (out_features, noise_dim), jnp.float32, -bound, bound)
    b_hyper = jax.random.uniform(k_b, (out_features,), jnp.float32, -bound, bound)
    # priormodel: randn, row-normalized, (eye*prior_std) @ W, bias = ones*prior_mean
    w_prior = jax.random.normal(k_p, (out_features, noise_dim), jnp.float32)
    w_prior = w_prior / jnp.linalg.norm(w_prior, axis=1, keepdims=True)
    w_prior = (jnp.eye(out_features, dtype=jnp.float32) * prior_std) @ w_prior
    b_prior = jnp.ones((out_features,), jnp.float32) * prior_mean
    return {"w_hyper": w_hyper, "b_hyper": b_hyper,
            "w_prior": w_prior, "b_prior": b_prior}


# --------------------------------------------------------------------------
# Pure-JAX reference (torch semantics)
# --------------------------------------------------------------------------
def reference_forward(z, x, prior_x, params, *, prior_scale, posterior_scale):
    theta = z @ params["w_hyper"].T + params["b_hyper"]
    prior_theta = z @ params["w_prior"].T + params["b_prior"]
    if x.ndim > 2:
        out = jnp.einsum('bd,bad->ba', theta, x)
        prior_out = jnp.einsum('bd,bad->ba', prior_theta, prior_x)
    elif x.shape[0] != z.shape[0]:
        out = theta @ x.T
        prior_out = prior_theta @ prior_x.T
    else:
        out = (x * theta).sum(-1)
        prior_out = (prior_x * prior_theta).sum(-1)
    return posterior_scale * out + prior_scale * prior_out


# --------------------------------------------------------------------------
if __name__ == "__main__":
    noise_dim = 32      # D
    out_features = 32   # F
    prior_scale, posterior_scale = 1.5, 0.75

    key = jax.random.PRNGKey(0)
    keys = jax.random.split(key, 10)
    params = init_params(keys[0], noise_dim, out_features, prior_mean=0.1, prior_std=2.0)

    def check(out, ref):
        np.testing.assert_allclose(np.asarray(out), np.asarray(ref), rtol=1e-3, atol=1e-3)

    # --- branch 1: 3-D x (einsum 'bd,bad->ba'), single-tile grid ---
    B, A = 8, 8
    z = jax.random.normal(keys[1], (B, noise_dim), jnp.float32)
    x = jax.random.normal(keys[2], (B, A, out_features), jnp.float32)
    px = jax.random.normal(keys[3], (B, A, out_features), jnp.float32)
    out = jax.block_until_ready(hyperlinear_forward(
        z, x, px, params, prior_scale=prior_scale, posterior_scale=posterior_scale))
    assert out.shape == (B, A)
    check(out, reference_forward(z, x, px, params,
                                 prior_scale=prior_scale, posterior_scale=posterior_scale))

    # --- branch 1 with B not divisible by the batch tile (partial blocks) ---
    B2, A2 = 20, 5
    z2 = jax.random.normal(keys[4], (B2, noise_dim), jnp.float32)
    x2 = jax.random.normal(keys[5], (B2, A2, out_features), jnp.float32)
    px2 = jax.random.normal(keys[6], (B2, A2, out_features), jnp.float32)
    out2 = jax.block_until_ready(hyperlinear_forward(
        z2, x2, px2, params, prior_scale=prior_scale, posterior_scale=posterior_scale))
    assert out2.shape == (B2, A2)
    check(out2, reference_forward(z2, x2, px2, params,
                                  prior_scale=prior_scale, posterior_scale=posterior_scale))

    # --- branch 2: 2-D x, mismatched leading dim (theta @ x.T), multi-step N grid ---
    N = 160
    x3 = jax.random.normal(keys[7], (N, out_features), jnp.float32)
    px3 = jax.random.normal(keys[8], (N, out_features), jnp.float32)
    out3 = jax.block_until_ready(hyperlinear_forward(
        z, x3, px3, params, prior_scale=prior_scale, posterior_scale=posterior_scale))
    assert out3.shape == (B, N)
    check(out3, reference_forward(z, x3, px3, params,
                                  prior_scale=prior_scale, posterior_scale=posterior_scale))

    # --- branch 3: 2-D x, matching batch ((x * theta).sum(-1)) ---
    x4 = x[:, 0, :]
    px4 = px[:, 0, :]
    out4 = jax.block_until_ready(hyperlinear_forward(
        z, x4, px4, params, prior_scale=prior_scale, posterior_scale=posterior_scale))
    assert out4.shape == (B,)
    check(out4, reference_forward(z, x4, px4, params,
                                  prior_scale=prior_scale, posterior_scale=posterior_scale))

    print("KERNEL_OK")
</pallas_src>

<mosaic_0001>
module attributes {stable_mosaic.version = 11 : i64} {
  func.func @_hyper_batched_kernel(%arg0: i32, %arg1: memref<8x32xf32, #tpu.memory_space<vmem>>, %arg2: memref<32x32xf32, #tpu.memory_space<vmem>>, %arg3: memref<1x32xf32, #tpu.memory_space<vmem>>, %arg4: memref<32x32xf32, #tpu.memory_space<vmem>>, %arg5: memref<1x32xf32, #tpu.memory_space<vmem>>, %arg6: memref<8x8x32xf32, #tpu.memory_space<vmem>>, %arg7: memref<8x8x32xf32, #tpu.memory_space<vmem>>, %arg8: memref<8x8xf32, #tpu.memory_space<vmem>>) attributes {dimension_semantics = [#tpu.dimension_semantics<parallel>], iteration_bounds = array<i64: 1>, scalar_prefetch = 0 : i64, scratch_operands = 0 : i64, tpu.core_type = #tpu.core_type<tc>, window_params = [{transform_indices = @transform_0, window_bounds = array<i64: 8, 32>}, {pipeline_mode = #tpu.pipeline_mode<synchronous>, transform_indices = @transform_1, window_bounds = array<i64: 32, 32>}, {pipeline_mode = #tpu.pipeline_mode<synchronous>, transform_indices = @transform_2, window_bounds = array<i64: 1, 32>}, {pipeline_mode = #tpu.pipeline_mode<synchronous>, transform_indices = @transform_3, window_bounds = array<i64: 32, 32>}, {pipeline_mode = #tpu.pipeline_mode<synchronous>, transform_indices = @transform_4, window_bounds = array<i64: 1, 32>}, {transform_indices = @transform_5, window_bounds = array<i64: 8, 8, 32>}, {transform_indices = @transform_6, window_bounds = array<i64: 8, 8, 32>}, {transform_indices = @transform_7, window_bounds = array<i64: 8, 8>}]} {
    %c0 = arith.constant 0 : index
    %c0_0 = arith.constant 0 : index
    %0 = vector.load %arg1[%c0, %c0_0] : memref<8x32xf32, #tpu.memory_space<vmem>>, vector<8x32xf32>
    %c0_1 = arith.constant 0 : index
    %c0_2 = arith.constant 0 : index
    %1 = vector.load %arg2[%c0_1, %c0_2] : memref<32x32xf32, #tpu.memory_space<vmem>>, vector<32x32xf32>
    %cst = arith.constant dense<0.000000e+00> : vector<8x32xf32>
    %2 = tpu.matmul %0, %1, %cst {dimension_numbers = #tpu.dot_dimension_numbers<[1], [0], [0], [1], [0, 0, 1, 1], [], []>} : vector<8x32xf32>, vector<32x32xf32>, vector<8x32xf32> -> vector<8x32xf32>
    %c0_3 = arith.constant 0 : index
    %c0_4 = arith.constant 0 : index
    %3 = vector.load %arg3[%c0_3, %c0_4] : memref<1x32xf32, #tpu.memory_space<vmem>>, vector<1x32xf32>
    %4 = vector.broadcast %3 : vector<1x32xf32> to vector<8x32xf32>
    %5 = arith.addf %2, %4 : vector<8x32xf32>
    %c0_5 = arith.constant 0 : index
    %c0_6 = arith.constant 0 : index
    %6 = vector.load %arg4[%c0_5, %c0_6] : memref<32x32xf32, #tpu.memory_space<vmem>>, vector<32x32xf32>
    %cst_7 = arith.constant dense<0.000000e+00> : vector<8x32xf32>
    %7 = tpu.matmul %0, %6, %cst_7 {dimension_numbers = #tpu.dot_dimension_numbers<[1], [0], [0], [1], [0, 0, 1, 1], [], []>} : vector<8x32xf32>, vector<32x32xf32>, vector<8x32xf32> -> vector<8x32xf32>
    %c0_8 = arith.constant 0 : index
    %c0_9 = arith.constant 0 : index
    %8 = vector.load %arg5[%c0_8, %c0_9] : memref<1x32xf32, #tpu.memory_space<vmem>>, vector<1x32xf32>
    %9 = vector.broadcast %8 : vector<1x32xf32> to vector<8x32xf32>
    %10 = arith.addf %7, %9 : vector<8x32xf32>
    %11 = vector.shape_cast %5 : vector<8x32xf32> to vector<8x1x32xf32>
    %c0_10 = arith.constant 0 : index
    %c0_11 = arith.constant 0 : index
    %c0_12 = arith.constant 0 : index
    %12 = vector.load %arg6[%c0_10, %c0_11, %c0_12] : memref<8x8x32xf32, #tpu.memory_space<vmem>>, vector<8x8x32xf32>
    %13 = vector.broadcast %11 : vector<8x1x32xf32> to vector<8x8x32xf32>
    %14 = arith.mulf %13, %12 : vector<8x8x32xf32>
    %cst_13 = arith.constant dense<0.000000e+00> : vector<8x8xf32>
    %15 = vector.multi_reduction <add>, %14, %cst_13 [2] : vector<8x8x32xf32> to vector<8x8xf32>
    %16 = vector.shape_cast %10 : vector<8x32xf32> to vector<8x1x32xf32>
    %c0_14 = arith.constant 0 : index
    %c0_15 = arith.constant 0 : index
    %c0_16 = arith.constant 0 : index
    %17 = vector.load %arg7[%c0_14, %c0_15, %c0_16] : memref<8x8x32xf32, #tpu.memory_space<vmem>>, vector<8x8x32xf32>
    %18 = vector.broadcast %16 : vector<8x1x32xf32> to vector<8x8x32xf32>
    %19 = arith.mulf %18, %17 : vector<8x8x32xf32>
    %cst_17 = arith.constant dense<0.000000e+00> : vector<8x8xf32>
    %20 = vector.multi_reduction <add>, %19, %cst_17 [2] : vector<8x8x32xf32> to vector<8x8xf32>
    %21 = arith.addf %15, %20 : vector<8x8xf32>
    %c0_18 = arith.constant 0 : index
    %c0_19 = arith.constant 0 : index
    %22 = vector.load %arg8[%c0_18, %c0_19] : memref<8x8xf32, #tpu.memory_space<vmem>>, vector<8x8xf32>
    tpu.vector_store %arg8[%c0_18, %c0_19], %21 {strides = array<i32>} : memref<8x8xf32, #tpu.memory_space<vmem>>, vector<8x8xf32>,
    return
  }
  func.func @transform_0(%arg0: i32) -> (i32, i32) {
    %c0_i32 = arith.constant 0 : i32
    %c0_i32_0 = arith.constant 0 : i32
    return %arg0, %c0_i32 : i32, i32
  }
  func.func @transform_1(%arg0: i32) -> (i32, i32) {
    %c0_i32 = arith.constant 0 : i32
    %c0_i32_0 = arith.constant 0 : i32
    %c0_i32_1 = arith.constant 0 : i32
    return %c0_i32, %c0_i32_0 : i32, i32
  }
  func.func @transform_2(%arg0: i32) -> (i32, i32) {
    %c0_i32 = arith.constant 0 : i32
    %c0_i32_0 = arith.constant 0 : i32
    %c0_i32_1 = arith.constant 0 : i32
    return %c0_i32, %c0_i32_0 : i32, i32
  }
  func.func @transform_3(%arg0: i32) -> (i32, i32) {
    %c0_i32 = arith.constant 0 : i32
    %c0_i32_0 = arith.constant 0 : i32
    %c0_i32_1 = arith.constant 0 : i32
    return %c0_i32, %c0_i32_0 : i32, i32
  }
  func.func @transform_4(%arg0: i32) -> (i32, i32) {
    %c0_i32 = arith.constant 0 : i32
    %c0_i32_0 = arith.constant 0 : i32
    %c0_i32_1 = arith.constant 0 : i32
    return %c0_i32, %c0_i32_0 : i32, i32
  }
  func.func @transform_5(%arg0: i32) -> (i32, i32, i32) {
    %c0_i32 = arith.constant 0 : i32
    %c0_i32_0 = arith.constant 0 : i32
    %c0_i32_1 = arith.constant 0 : i32
    return %arg0, %c0_i32, %c0_i32_0 : i32, i32, i32
  }
  func.func @transform_6(%arg0: i32) -> (i32, i32, i32) {
    %c0_i32 = arith.constant 0 : i32
    %c0_i32_0 = arith.constant 0 : i32
    %c0_i32_1 = arith.constant 0 : i32
    return %arg0, %c0_i32, %c0_i32_0 : i32, i32, i32
  }
  func.func @transform_7(%arg0: i32) -> (i32, i32) {
    %c0_i32 = arith.constant 0 : i32
    %c0_i32_0 = arith.constant 0 : i32
    return %arg0, %c0_i32 : i32, i32
  }
}

</mosaic_0001>

<bundles_post_ra>
// kernel: tpu_custom_call.1
= control target key start
LH: loop header
LB: loop body
LE: loop exit
PB: predicated region body
PF: predicated region fallthrough
CT: control target
= control target key end

     0   :  { %12 = vsyncpa [#allocation3], 0  ;;  %s1003_s0 = inlined_call_operand.hbm [shape: f32[8,32], index: 0, kind: input, shape index: {}]   ;;  %s1004_s1 = inlined_call_operand.hbm [shape: f32[32,32], index: 1, kind: input, shape index: {}]   ;;  %s1005_s2 = inlined_call_operand.vmem [shape: f32[1,32], index: 2, kind: input, shape index: {}]   ;;  %s1006_s3 = inlined_call_operand.hbm [shape: f32[32,32], index: 3, kind: input, shape index: {}]   ;;  %s1007_s4 = inlined_call_operand.vmem [shape: f32[1,32], index: 4, kind: input, shape index: {}]   ;;  %s1008_s5 = inlined_call_operand.hbm [shape: f32[8,8,32], index: 5, kind: input, shape index: {}]   ;;  %s1009_s6 = inlined_call_operand.hbm [shape: f32[8,8,32], index: 6, kind: input, shape index: {}]   ;;  %s1010_s7 = inlined_call_operand.hbm [shape: f32[8,8], index: 7, kind: output, shape index: {}]  }
   0x1   :  { %13 = vsyncpa [#allocation6], 0 }
   0x2   :  { %14 = vsyncpa [#allocation9], 0 }
   0x3   :  { %15 = vsyncpa [#allocation4], 0  ;;  %s804_s24 = smov [#allocation5]   ;;  %s664_s28 = scalar_lea.hbm %s1004_s1, 512 }
   0x4   :  { %s31_s25 = sshll.u32 %s804_s24, 4  ;;  %p665_p0 = scmp.ne.s32.totalorder %s1004_s1, %s664_s28  ;;  %s32_s25 = int_to_ptr.vmem [resolvable:$true] %s31_s25 }
   0x5   :  { %p668_p1 = scmp.lt.u32.totalorder %s664_s28, %s1004_s1 }
   0x7   :  { %p670_p2 = pnand %p668_p1, %p665_p0 }
   0x9   :  { %673 = shalt.err (!%p670_p2)
}
   0xa   :  { %s674_s10 = scalar_lea.vmem %s32_s25, 512  ;;  %p679_p4 = scmp.lt.s32.totalorder %s32_s25, %s32_s25 }
   0xb   :  { %p675_p3 = scmp.ne.s32.totalorder %s32_s25, %s674_s10  ;;  %p680_p5 = scmp.lt.s32.totalorder %s674_s10, %s674_s10 }
   0xd   :  { %p681_p6 = por %p680_p5, %p679_p4 }
   0xf   :  { %p682_p7 = pnand %p681_p6, %p675_p3 }
  0x11   :  { %685 = shalt.err (!%p682_p7)
}
  0x12   :  { %s805_s11 = smov 128   ;;  %s806_s12 = smov 8  }
  0x13   :  { %37 = dma.hbm_to_vmem [thread:$0]  %s1004_s1, 512, %s32_s25, [#allocation6], %s805_s11, %s805_s11, %s806_s12  }
  0x14   :  { %s807_s15 = smov [#allocation8]   ;;  %s808_s17 = smov [#allocation2]  }
  0x15   :  { %s59_s16 = sshll.u32 %s807_s15, 4  ;;  %s22_s18 = sshll.u32 %s808_s17, 4  ;;  %s60_s16 = int_to_ptr.vmem [resolvable:$true] %s59_s16  ;;  %s23_s18 = int_to_ptr.vmem [resolvable:$true] %s22_s18 }
  0x16   :  { %s686_s21 = scalar_lea.hbm %s1008_s5, 1024 }
  0x17   :  { %p687_p8 = scmp.ne.s32.totalorder %s1008_s5, %s686_s21  ;;  %p690_p9 = scmp.lt.u32.totalorder %s686_s21, %s1008_s5 }
  0x19   :  { %p692_p10 = pnand %p690_p9, %p687_p8 }
  0x1b   :  { %695 = shalt.err (!%p692_p10)
}
  0x1c   :  { %s696_s1 = scalar_lea.vmem %s60_s16, 1024  ;;  %p701_p12 = scmp.lt.s32.totalorder %s60_s16, %s60_s16 }
  0x1d   :  { %p697_p11 = scmp.ne.s32.totalorder %s60_s16, %s696_s1  ;;  %p702_p13 = scmp.lt.s32.totalorder %s696_s1, %s696_s1 }
  0x1f   :  { %p703_p0 = por %p702_p13, %p701_p12 }
  0x21   :  { %p704_p1 = pnand %p703_p0, %p697_p11 }
  0x23   :  { %707 = shalt.err (!%p704_p1)
}
  0x24   :  { %65 = dma.hbm_to_vmem [thread:$0]  %s1008_s5, 1024, %s60_s16, [#allocation9], %s805_s11, %s805_s11, %s806_s12  }
  0x25   :  { %s708_s30 = scalar_lea.hbm %s1003_s0, 128 }
  0x26   :  { %p709_p2 = scmp.ne.s32.totalorder %s1003_s0, %s708_s30  ;;  %p712_p3 = scmp.lt.u32.totalorder %s708_s30, %s1003_s0 }
  0x28   :  { %p714_p4 = pnand %p712_p3, %p709_p2 }
  0x2a   :  { %717 = shalt.err (!%p714_p4)
}
  0x2b   :  { %s718_s14 = scalar_lea.vmem %s23_s18, 128  ;;  %p723_p6 = scmp.lt.s32.totalorder %s23_s18, %s23_s18 }
  0x2c   :  { %p719_p5 = scmp.ne.s32.totalorder %s23_s18, %s718_s14  ;;  %p724_p7 = scmp.lt.s32.totalorder %s718_s14, %s718_s14 }
  0x2e   :  { %p725_p8 = por %p724_p7, %p723_p6 }
  0x30   :  { %p726_p9 = pnand %p725_p8, %p719_p5 }
  0x32   :  { %729 = shalt.err (!%p726_p9)
}
  0x33   :  { %25 = dma.hbm_to_vmem [thread:$0]  %s1003_s0, 128, %s23_s18, [#allocation3]  }
  0x34   :  { %s809_s16 = smov [#allocation7]   ;;  %s810_s19 = smov [#allocation10]  }
  0x35   :  { %s45_s17 = sshll.u32 %s809_s16, 4  ;;  %s71_s20 = sshll.u32 %s810_s19, 4  ;;  %s46_s17 = int_to_ptr.vmem [resolvable:$true] %s45_s17  ;;  %s72_s20 = int_to_ptr.vmem [resolvable:$true] %s71_s20 }
  0x36   :  { %s730_s23 = scalar_lea.hbm %s1006_s3, 512 }
  0x37   :  { %p731_p10 = scmp.ne.s32.totalorder %s1006_s3, %s730_s23  ;;  %p734_p11 = scmp.lt.u32.totalorder %s730_s23, %s1006_s3 }
  0x39   :  { %p736_p12 = pnand %p734_p11, %p731_p10 }
  0x3b   :  { %739 = shalt.err (!%p736_p12)
}
  0x3c   :  { %s740_s0 = scalar_lea.vmem %s46_s17, 512  ;;  %p745_p0 = scmp.lt.s32.totalorder %s46_s17, %s46_s17 }
  0x3d   :  { %p741_p13 = scmp.ne.s32.totalorder %s46_s17, %s740_s0  ;;  %p746_p1 = scmp.lt.s32.totalorder %s740_s0, %s740_s0 }
  0x3f   :  { %p747_p2 = por %p746_p1, %p745_p0 }
  0x41   :  { %p748_p3 = pnand %p747_p2, %p741_p13 }
  0x43   :  { %751 = shalt.err (!%p748_p3)
}
  0x44   :  { %51 = dma.hbm_to_vmem [thread:$0]  %s1006_s3, 512, %s46_s17, [#allocation6], %s805_s11, %s805_s11, %s806_s12  }
  0x45   :  { %s752_s30 = scalar_lea.hbm %s1009_s6, 1024 }
  0x46   :  { %p753_p4 = scmp.ne.s32.totalorder %s1009_s6, %s752_s30  ;;  %p756_p5 = scmp.lt.u32.totalorder %s752_s30, %s1009_s6 }
  0x48   :  { %p758_p6 = pnand %p756_p5, %p753_p4 }
  0x4a   :  { %761 = shalt.err (!%p758_p6)
}
  0x4b   :  { %s762_s14 = scalar_lea.vmem %s72_s20, 1024  ;;  %p767_p8 = scmp.lt.s32.totalorder %s72_s20, %s72_s20 }
  0x4c   :  { %p763_p7 = scmp.ne.s32.totalorder %s72_s20, %s762_s14  ;;  %p768_p9 = scmp.lt.s32.totalorder %s762_s14, %s762_s14 }
  0x4e   :  { %p769_p10 = por %p768_p9, %p767_p8 }
  0x50   :  { %p770_p11 = pnand %p769_p10, %p763_p7 }
  0x52   :  { %773 = shalt.err (!%p770_p11)
}
  0x53   :  { %77 = dma.hbm_to_vmem [thread:$0]  %s1009_s6, 1024, %s72_s20, [#allocation9], %s805_s11, %s805_s11, %s806_s12  }
  0x54   :  { %796 = dma.done.wait [#allocation3], 128  }
  0x55   :  { %797 = vsyncadd [#allocation3], 4294967168 }
  0x56   :  { %798 = dma.done.wait [#allocation6], 1024  }
  0x57   :  { %799 = vsyncadd [#allocation6], 4294966272 }
  0x58   :  { %800 = dma.done.wait [#allocation9], 2048  }
  0x59   :  { %801 = vsyncadd [#allocation9], 4294965248  ;;  %v811_v0 = vmov 0.0|0.0   ;;  %vm812_vm0 = vmmov 0   ;;  %v813_v1 = vmov 0.0   ;;  %v94_v2 = vld [vmem:[#allocation5] sm:$0xff]  ;;  %v265_v17 = vlaneseq }
  0x5a   :  { %640 = vmatprep.subr.bf16.mxu0 %v811_v0  ;;  %646 = vmatprep.subr.bf16.mxu1 %v811_v0  ;;  %v95_v3 = vld [vmem:[#allocation5 + $0x8] sm:$0xff]  ;;  %v179_v4 = vld [vmem:[#allocation7] sm:$0xff]  ;;  %v96_v7 = vld [vmem:[#allocation5 + $0x10] sm:$0xff]  ;;  %vm105_vm1 = vcmask 261120   ;;  %v814_v15 = vmov 1966171168  }
  0x5b   :  { %626 = vmatprep.mubr.msk.f32.mxu0 %vm812_vm0, %v813_v1  ;;  %637 = vmatprep.mubr.msk.f32.mxu1 %vm812_vm0, %v813_v1  ;;  %v641_v5 = vpack.c.bf16 %v95_v3, %v94_v2  ;;  %v180_v6 = vld [vmem:[#allocation7 + $0x8] sm:$0xff]  ;;  %v97_v8 = vld [vmem:[#allocation5 + $0x18] sm:$0xff]  ;;  %v181_v10 = vld [vmem:[#allocation7 + $0x10] sm:$0xff]  ;;  %v263_v16 = vunpack.c.l.s4 %v814_v15  ;;  %v931_v19 = vshrl.u32 %v265_v17, 7  ;;  %vm570_vm2 = vcmask 1041409  }
  0x5c   :  { %v647_v9 = vpack.c.bf16 %v180_v6, %v179_v4  ;;  %v182_v11 = vld [vmem:[#allocation7 + $0x18] sm:$0xff]  ;;  %v644_v12 = vpack.c.bf16 %v97_v8, %v96_v7  ;;  %v310_v38 = vld [vmem:[#allocation8] sm:$0xff]  ;;  %v311_v47 = vld [vmem:[#allocation8 + $0x8] sm:$0xff]  ;;  %vm572_vm3 = vcmask 1042434   ;;  %vm574_vm4 = vcmask 1043459  }
  0x5d   :  { %642 = vmatpush3.bf16.msra.mxu0 %v641_v5  ;;  %v650_v13 = vpack.c.bf16 %v182_v11, %v181_v10  ;;  %v93_v14 = vld [vmem:[#allocation2] sm:$0xff]  ;;  %v264_v18 = vunpack.c.0.s8 %v263_v16  ;;  %v944_v31 = vsub.s32 0, %v931_v19  ;;  %v440_v40 = vld [vmem:[#allocation10] sm:$0xff]  ;;  %v441_v50 = vld [vmem:[#allocation10 + $0x8] sm:$0xff]  ;;  %vm576_vm5 = vcmask 1044484  }
  0x5e   :  { %648 = vmatpush3.bf16.msra.mxu1 %v647_v9  ;;  %643 = vmatprep.subr.bf16.mxu0 %v811_v0  ;;  %v604_v20 = vld [vmem:[%s1005_s2] ss:$0 sm:$0xff]  ;;  %v312_v61 = vld [vmem:[#allocation8 + $0x10] sm:$0xff]  ;;  %v314_v9 = vld [vmem:[#allocation8 + $0x20] sm:$0xff]  ;;  %vm578_vm6 = vcmask 1045509   ;;  %vm580_vm7 = vcmask 1046534  }
  0x5f   :  { %649 = vmatprep.subr.bf16.mxu1 %v811_v0  ;;  %v937_v21 = vsub.s32 %v264_v18, %v931_v19  ;;  %v606_v22 = vld [vmem:[%s1007_s4] ss:$0 sm:$0xff]  ;;  %v442_v63 = vld [vmem:[#allocation10 + $0x10] sm:$0xff]  ;;  %v444_v11 = vld [vmem:[#allocation10 + $0x20] sm:$0xff]  ;;  %s815_s2 = smov [#allocation11]   ;;  %vm582_vm8 = vcmask 1047559  }
  0x60   :  { %s593_s4 = sshll.u32 %s815_s2, 4  ;;  %vm585_vm9 = vcmask 64512   ;;  %s594_s4 = int_to_ptr.vmem [resolvable:$true] %s593_s4 }
  0x61   :  { %645 = vmatpush3.bf16.msra.mxu0 %v644_v12  ;;  %s774_s16 = scalar_lea.vmem %s594_s4, 128  ;;  %p779_p13 = scmp.lt.s32.totalorder %s594_s4, %s594_s4 }
  0x62   :  { %651 = vmatpush3.bf16.msra.mxu1 %v650_v13  ;;  %p775_p12 = scmp.ne.s32.totalorder %s594_s4, %s774_s16  ;;  %p780_p0 = scmp.lt.s32.totalorder %s774_s16, %s774_s16 }
  0x64   :  { %627 = vmatmul.mubr.msk.f32.vlgmr.msra.gmra.mrb[0].mxu0 %vm105_vm1, %v93_v14  ;;  %p781_p1 = por %p780_p0, %p779_p13 }
  0x65   :  { %638 = vmatmul.mubr.msk.f32.vlgmr.msra.gmra.mrb[0].mxu1 %vm105_vm1, %v93_v14 }
  0x66   :  { %p782_p2 = pnand %p781_p1, %p775_p12 }
 0x137   :  { %v175_v23 = vpop.f32.mrb[0].mxu0 }
 0x138   :  { %v176_v24 = vadd.f32 %v604_v20, %v175_v23  ;;  %v256_v25 = vpop.f32.mrb[0].mxu1  ;;  %v628_v26 = vpop.f32.mrb[1].mxu0 }
 0x139   :  { %v257_v27 = vadd.f32 %v606_v22, %v256_v25  ;;  %v639_v28 = vpop.f32.mrb[1].mxu1  ;;  %v313_v22 = vld [vmem:[#allocation8 + $0x18] sm:$0xff] }
 0x13a   :  { %v261_v29 = vcombine.high %v176_v24, %v176_v24  ;;  %v268_v30 = vrot.slane %v176_v24, %v937_v21  ;;  %v443_v24 = vld [vmem:[#allocation10 + $0x18] sm:$0xff] }
 0x13b   :  { %v391_v32 = vcombine.high %v257_v27, %v257_v27  ;;  %v398_v33 = vrot.slane %v257_v27, %v937_v21 }
 0x13c   :  { %v276_v34 = vcombine.high %v268_v30, %v268_v30  ;;  %v284_v35 = vrot.slane %v268_v30, %v937_v21  ;;  %v275_v39 = vrot.slane %v261_v29, %v937_v21 }
 0x13d   :  { %v406_v36 = vcombine.high %v398_v33, %v398_v33  ;;  %v414_v37 = vrot.slane %v398_v33, %v937_v21  ;;  %v405_v44 = vrot.slane %v391_v32, %v937_v21  ;;  %v315_v33 = vld [vmem:[#allocation8 + $0x28] sm:$0xff] }
 0x13e   :  { %v321_v41 = vrot.slane %v284_v35, %v944_v31  ;;  %v298_v42 = vrot.slane %v276_v34, %v937_v21  ;;  %v306_v43 = vcombine.high %v284_v35, %v284_v35  ;;  %v291_v57 = vrot.slane %v275_v39, %v937_v21  ;;  %v445_v35 = vld [vmem:[#allocation10 + $0x28] sm:$0xff] }
 0x13f   :  { %v451_v45 = vrot.slane %v414_v37, %v944_v31  ;;  %v428_v46 = vrot.slane %v406_v36, %v937_v21  ;;  %v436_v48 = vcombine.high %v414_v37, %v414_v37  ;;  %v421_v62 = vrot.slane %v405_v44, %v937_v21 }
 0x140   :  { %v358_v49 = vmul.f32 %v321_v41, %v310_v38  ;;  %v325_v51 = vrot.slane %v298_v42, %v944_v31  ;;  %v329_v56 = vrot.slane %v306_v43, %v944_v31  ;;  %v277_v0 = vcombine.high %v275_v39, %v275_v39 }
 0x141   :  { %v488_v52 = vmul.f32 %v451_v45, %v440_v40  ;;  %v455_v53 = vrot.slane %v428_v46, %v944_v31  ;;  %v459_v60 = vrot.slane %v436_v48, %v944_v31  ;;  %v407_v1 = vcombine.high %v405_v44, %v405_v44  ;;  %v446_v44 = vld [vmem:[#allocation10 + $0x30] sm:$0xff] }
 0x142   :  { %v366_v54 = vsel %vm105_vm1, %v358_v49, 0.0  ;;  %v359_v55 = vmul.f32 %v325_v51, %v311_v47  ;;  %v360_v3 = vmul.f32 %v329_v56, %v312_v61  ;;  %v337_v4 = vrot.slane %v291_v57, %v944_v31  ;;  %v317_v51 = vld [vmem:[#allocation8 + $0x38] sm:$0xff] }
 0x143   :  { %v496_v58 = vsel %vm105_vm1, %v488_v52, 0.0  ;;  %367 = vadd.xlane.f32.xlu0 %v366_v54  ;;  %v489_v59 = vmul.f32 %v455_v53, %v441_v50  ;;  %v308_v5 = vcombine.high %v298_v42, %v298_v42  ;;  %v490_v7 = vmul.f32 %v459_v60, %v442_v63  ;;  %v316_v42 = vld [vmem:[#allocation8 + $0x30] sm:$0xff]  ;;  %v447_v52 = vld [vmem:[#allocation10 + $0x38] sm:$0xff] }
 0x144   :  { %497 = vadd.xlane.f32.xlu1 %v496_v58  ;;  %v369_v2 = vsel %vm105_vm1, %v359_v55, 0.0  ;;  %v467_v8 = vrot.slane %v421_v62, %v944_v31  ;;  %v438_v10 = vcombine.high %v428_v46, %v428_v46  ;;  %v372_v12 = vsel %vm105_vm1, %v360_v3, 0.0 }
 0x145   :  { %v499_v6 = vsel %vm105_vm1, %v489_v59, 0.0  ;;  %v362_v13 = vmul.f32 %v337_v4, %v314_v9  ;;  %v333_v14 = vrot.slane %v308_v5, %v944_v31  ;;  %v305_v15 = vrot.slane %v277_v0, %v937_v21 }
 0x146   :  { %v502_v16 = vsel %vm105_vm1, %v490_v7, 0.0  ;;  %v492_v18 = vmul.f32 %v467_v8, %v444_v11  ;;  %v463_v20 = vrot.slane %v438_v10, %v944_v31  ;;  %v435_v23 = vrot.slane %v407_v1, %v937_v21 }
 0x147   :  { %370 = vadd.xlane.f32.xlu0 %v369_v2  ;;  %v378_v25 = vsel %vm105_vm1, %v362_v13, 0.0  ;;  %v361_v26 = vmul.f32 %v333_v14, %v313_v22  ;;  %v341_v27 = vrot.slane %v305_v15, %v944_v31  ;;  %v307_v28 = vcombine.high %v291_v57, %v291_v57 }
 0x148   :  { %500 = vadd.xlane.f32.xlu1 %v499_v6  ;;  %v508_v29 = vsel %vm105_vm1, %v492_v18, 0.0  ;;  %v491_v30 = vmul.f32 %v463_v20, %v443_v24  ;;  %v471_v32 = vrot.slane %v435_v23, %v944_v31  ;;  %v437_v34 = vcombine.high %v421_v62, %v421_v62 }
 0x149   :  { %v375_v21 = vsel %vm105_vm1, %v361_v26, 0.0  ;;  %v363_v36 = vmul.f32 %v341_v27, %v315_v33  ;;  %v345_v37 = vrot.slane %v307_v28, %v944_v31  ;;  %v309_v38 = vcombine.high %v305_v15, %v305_v15 }
 0x14a   :  { %v505_v39 = vsel %vm105_vm1, %v491_v30, 0.0  ;;  %v493_v40 = vmul.f32 %v471_v32, %v445_v35  ;;  %v475_v41 = vrot.slane %v437_v34, %v944_v31  ;;  %v439_v43 = vcombine.high %v435_v23, %v435_v23 }
 0x14b   :  { %373 = vadd.xlane.f32.xlu0 %v372_v12  ;;  %v381_v45 = vsel %vm105_vm1, %v363_v36, 0.0  ;;  %v364_v46 = vmul.f32 %v345_v37, %v316_v42  ;;  %v349_v47 = vrot.slane %v309_v38, %v944_v31  ;;  %v537_v2 = vand.u32 127, %v265_v17 }
 0x14c   :  { %503 = vadd.xlane.f32.xlu1 %v502_v16  ;;  %v511_v48 = vsel %vm105_vm1, %v493_v40, 0.0  ;;  %v494_v49 = vmul.f32 %v475_v41, %v446_v44  ;;  %v479_v50 = vrot.slane %v439_v43, %v944_v31 }
 0x14d   :  { %v384_v53 = vsel %vm105_vm1, %v364_v46, 0.0  ;;  %v365_v54 = vmul.f32 %v349_v47, %v317_v51  ;;  %v540_v7 = vsub.s32 %v537_v2, %v931_v19 }
 0x14e   :  { %v514_v55 = vsel %vm105_vm1, %v494_v49, 0.0  ;;  %v495_v56 = vmul.f32 %v479_v50, %v447_v52 }
 0x14f   :  { %379 = vadd.xlane.f32.xlu0 %v378_v25  ;;  %v387_v57 = vsel %vm105_vm1, %v365_v54, 0.0 }
 0x150   :  { %509 = vadd.xlane.f32.xlu1 %v508_v29  ;;  %v517_v58 = vsel %vm105_vm1, %v495_v56, 0.0 }
 0x153   :  { %376 = vadd.xlane.f32.xlu0 %v375_v21 }
 0x154   :  { %506 = vadd.xlane.f32.xlu1 %v505_v39 }
 0x157   :  { %382 = vadd.xlane.f32.xlu0 %v381_v45 }
 0x158   :  { %512 = vadd.xlane.f32.xlu1 %v511_v48 }
 0x15b   :  { %385 = vadd.xlane.f32.xlu0 %v384_v53 }
 0x15c   :  { %515 = vadd.xlane.f32.xlu1 %v514_v55 }
 0x15f   :  { %388 = vadd.xlane.f32.xlu0 %v387_v57 }
 0x160   :  { %518 = vadd.xlane.f32.xlu1 %v517_v58 }
 0x1d0   :  { %v368_v59 = vpop.xlane.xlu0 %367 }
 0x1d1   :  { %v498_v60 = vpop.xlane.xlu1 %497 }
 0x1d2   :  { %v520_v8 = vadd.f32 %v498_v60, %v368_v59 }
 0x1d4   :  { %v371_v31 = vpop.xlane.xlu0 %370  ;;  %v541_v14 = vrot.slane %v520_v8, %v540_v7 }
 0x1d5   :  { %v501_v61 = vpop.xlane.xlu1 %500 }
 0x1d6   :  { %v521_v5 = vadd.f32 %v501_v61, %v371_v31 }
 0x1d8   :  { %v374_v62 = vpop.xlane.xlu0 %373  ;;  %v545_v12 = vrot.slane %v521_v5, %v540_v7 }
 0x1d9   :  { %v504_v63 = vpop.xlane.xlu1 %503 }
 0x1da   :  { %v522_v6 = vadd.f32 %v504_v63, %v374_v62  ;;  %v571_v22 = vsel %vm570_vm2, %v545_v12, %v541_v14 }
 0x1dc   :  { %v380_v0 = vpop.xlane.xlu0 %379  ;;  %v549_v13 = vrot.slane %v522_v6, %v540_v7 }
 0x1dd   :  { %v510_v1 = vpop.xlane.xlu1 %509 }
 0x1de   :  { %v524_v20 = vadd.f32 %v510_v1, %v380_v0  ;;  %v573_v24 = vsel %vm572_vm3, %v549_v13, %v571_v22 }
 0x1e0   :  { %v377_v3 = vpop.xlane.xlu0 %376  ;;  %v557_v27 = vrot.slane %v524_v20, %v540_v7 }
 0x1e1   :  { %v507_v4 = vpop.xlane.xlu1 %506 }
 0x1e2   :  { %v523_v9 = vadd.f32 %v507_v4, %v377_v3 }
 0x1e4   :  { %v383_v10 = vpop.xlane.xlu0 %382  ;;  %v553_v15 = vrot.slane %v523_v9, %v540_v7 }
 0x1e5   :  { %v513_v11 = vpop.xlane.xlu1 %512 }
 0x1e6   :  { %v525_v16 = vadd.f32 %v513_v11, %v383_v10  ;;  %v575_v25 = vsel %vm574_vm4, %v553_v15, %v573_v24 }
 0x1e7   :  { %v577_v32 = vsel %vm576_vm5, %v557_v27, %v575_v25 }
 0x1e8   :  { %v386_v18 = vpop.xlane.xlu0 %385  ;;  %v561_v19 = vrot.slane %v525_v16, %v540_v7 }
 0x1e9   :  { %v516_v17 = vpop.xlane.xlu1 %515 }
 0x1ea   :  { %v526_v23 = vadd.f32 %v516_v17, %v386_v18  ;;  %v579_v33 = vsel %vm578_vm6, %v561_v19, %v577_v32 }
 0x1ec   :  { %v389_v26 = vpop.xlane.xlu0 %388  ;;  %v565_v28 = vrot.slane %v526_v23, %v540_v7 }
 0x1ed   :  { %v519_v29 = vpop.xlane.xlu1 %518 }
 0x1ee   :  { %v527_v30 = vadd.f32 %v519_v29, %v389_v26  ;;  %v581_v35 = vsel %vm580_vm7, %v565_v28, %v579_v33 }
 0x1f0   :  { %v569_v34 = vrot.slane %v527_v30, %v540_v7 }
 0x1f2   :  { %v583_v21 = vsel %vm582_vm8, %v569_v34, %v581_v35 }
 0x1f3   :  { %586 = vst.msk [vmem:[#allocation11] sm:$0xff] %vm585_vm9, %v583_v21 }
 0x1f4   :  { %785 = shalt.err (!%p782_p2)
}
 0x1f5   :  { %s786_s20 = scalar_lea.hbm %s1010_s7, 128 }
 0x1f6   :  { %p787_p3 = scmp.ne.s32.totalorder %s1010_s7, %s786_s20  ;;  %p790_p4 = scmp.lt.u32.totalorder %s786_s20, %s1010_s7 }
 0x1f8   :  { %p792_p5 = pnand %p790_p4, %p787_p3 }
 0x1fa   :  { %795 = shalt.err (!%p792_p5)
}
 0x1fb   :  { %596 = dma.vmem_to_hbm [thread:$0]  %s594_s4, 128, %s1010_s7, [#allocation4]  }
 0x1fc   :  { %802 = dma.done.wait [#allocation4], 128  }
 0x1fd   :  { %803 = vsyncadd [#allocation4], 4294967168 }
 0x1fe   :  { %600 = vsyncpa [#allocation3], 1 }
 0x1ff   :  { %601 = vsyncpa [#allocation6], 1 }
 0x200   :  { %602 = vsyncpa [#allocation9], 1 }
 0x201   :  { %603 = vsyncpa [#allocation4], 1 }

</bundles_post_ra>
